<compile_context>
chip_gen: v6e
topology: v6e:2x2x1
jax: 0.10.0
libtpu: 0.0.40
codegen_flags: <defaults>
</compile_context>

<pallas_src>
import jax
import jax.numpy as jnp
import numpy as np
from jax.experimental import pallas as pl
from jax.experimental.pallas import tpu as pltpu

EPS = 1e-5  # nn.BatchNorm2d default eps


def _make_resblock_kernel(N, C, H, W):
    HW = H * W
    R = N * C                       # sublane rows: r = n * C + c  (n-major)
    inv_count = float(1.0 / (N * HW))

    def kernel(x_ref, w1_ref, g1_ref, b1_ref, w2_ref, g2_ref, b2_ref,
               mask_ref, o_ref):
        x = x_ref[...]                                      # (R, HW)

        def tap_stack(v):
            # Stack the 9 shifted (and boundary-masked) copies of v along
            # sublanes: T[t*R + r, p] = v[r, p shifted by tap t] (0 outside).
            taps = []
            m = 0
            for t in range(9):
                dy, dx = t // 3 - 1, t % 3 - 1
                if dy == 0 and dx == 0:
                    taps.append(v)
                else:
                    rolled = pltpu.roll(v, shift=(-(dy * W + dx)) % HW, axis=1)
                    taps.append(rolled * mask_ref[m])       # mask is lane-only
                    m += 1
            return jnp.concatenate(taps, axis=0)            # (9*R, HW)

        def conv3x3(v, w_ref):
            # Single MXU matmul: (R, 9R) @ (9R, HW) -> (R, HW).
            return jnp.dot(w_ref[...], tap_stack(v),
                           preferred_element_type=jnp.float32)

        def batchnorm(acc, g_ref, b_ref):
            # Lane-reduce first, then combine the N batch replicas of each
            # channel with sublane rolls of the tiny (R,1) sums.
            s = jnp.sum(acc, axis=1, keepdims=True)          # (R, 1)
            s2 = jnp.sum(acc * acc, axis=1, keepdims=True)   # (R, 1)
            cs, cs2 = s, s2
            for i in range(1, N):
                cs = cs + pltpu.roll(s, shift=i * C, axis=0)
                cs2 = cs2 + pltpu.roll(s2, shift=i * C, axis=0)
            mean = cs * inv_count                            # E[x]   per row
            ex2 = cs2 * inv_count                            # E[x^2] per row
            inv = jax.lax.rsqrt(ex2 - mean * mean + EPS)
            return (acc - mean) * (inv * g_ref[...]) + b_ref[...]

        mid = jnp.maximum(batchnorm(conv3x3(x, w1_ref), g1_ref, b1_ref), 0.0)
        out = batchnorm(conv3x3(mid, w2_ref), g2_ref, b2_ref) + x
        o_ref[...] = jnp.maximum(out, 0.0)   # residual + relu, full-tile store

    return kernel


def _conv_weight_matrix(w, N):
    """OIHW (Cout, Cin, 3, 3) -> (N*Cout, 9*N*Cin) block weight matrix.

    wmat[n*Cout + co, t*(N*Cin) + n'*Cin + ci] = w[co, ci, ky, kx] * [n == n']
    with t = ky*3 + kx, matching the in-kernel tap stack (n-major rows).
    """
    Cout, Cin = w.shape[0], w.shape[1]
    wk = jnp.transpose(w.reshape(Cout, Cin, 9).astype(jnp.float32),
                       (2, 0, 1))                            # (9, Cout, Cin)
    eye = jnp.eye(N, dtype=jnp.float32)
    blk = jnp.einsum('tac,nm->natmc', wk, eye)               # (N,Cout,9,N,Cin)
    return blk.reshape(N * Cout, 9 * N * Cin)


def _bn_column(v, N):
    # n-major rows: col[n*C + c] = v[c]
    return jnp.tile(v.astype(jnp.float32), N)[:, None]       # (N*C, 1)


def _boundary_masks(N, C, H, W):
    """(8, R, HW) f32 masks for the 8 non-center taps (lane-position only)."""
    HW, R = H * W, N * C
    lane = np.arange(HW)
    h, wv = lane // W, lane % W
    masks = []
    for dy in (-1, 0, 1):
        for dx in (-1, 0, 1):
            if dy == 0 and dx == 0:
                continue
            valid = np.ones(HW, dtype=bool)
            if dy == -1:
                valid &= h >= 1
            if dy == 1:
                valid &= h < H - 1
            if dx == -1:
                valid &= wv >= 1
            if dx == 1:
                valid &= wv < W - 1
            masks.append(np.broadcast_to(valid.astype(np.float32), (R, HW)))
    return jnp.asarray(np.stack(masks, axis=0))              # (8, R, HW)


@jax.jit
def resblock_pallas(x, w1, g1, b1, w2, g2, b2):
    N, Cin, H, W = x.shape
    Cmid, Cout = w1.shape[0], w2.shape[0]
    assert Cin == Cmid == Cout, "ResBlock residual path assumes inplanes == planes"
    C = Cin
    R, HW = N * C, H * W

    # n-major rows => pure reshapes in and out (no transpose copies).
    x_slab = x.reshape(R, HW)

    w1m = _conv_weight_matrix(w1, N)
    w2m = _conv_weight_matrix(w2, N)
    g1c, b1c = _bn_column(g1, N), _bn_column(b1, N)
    g2c, b2c = _bn_column(g2, N), _bn_column(b2, N)
    masks = _boundary_masks(N, C, H, W)     # jit-time constant

    vmem = pl.BlockSpec(memory_space=pltpu.MemorySpace.VMEM)
    flops = 2 * (2 * R * (9 * R) * HW) + 24 * R * HW          # matmuls + elementwise
    bytes_accessed = 4 * (2 * R * HW + 2 * int(w1m.size) + 8 * R * HW + 4 * R)

    out_slab = pl.pallas_call(
        _make_resblock_kernel(N, C, H, W),
        out_shape=jax.ShapeDtypeStruct((R, HW), jnp.float32),
        in_specs=[vmem] * 8,
        out_specs=vmem,
        cost_estimate=pl.CostEstimate(
            flops=flops, transcendentals=2 * R, bytes_accessed=bytes_accessed),
    )(x_slab, w1m, g1c, b1c, w2m, g2c, b2c, masks)

    return out_slab.reshape(N, C, H, W)


def resblock_reference(x, w1, g1, b1, w2, g2, b2):
    # TODO(synk): matches nn.BatchNorm2d training-mode forward (batch stats);
    # eval-mode running-stats inference is a different (affine-only) path.
    def conv(x, w):
        return jax.lax.conv_general_dilated(
            x, w, window_strides=(1, 1), padding=((1, 1), (1, 1)),
            dimension_numbers=("NCHW", "OIHW", "NCHW"),
            precision=jax.lax.Precision.HIGHEST)

    def bn(x, g, b):
        mu = x.mean(axis=(0, 2, 3), keepdims=True)
        var = ((x - mu) ** 2).mean(axis=(0, 2, 3), keepdims=True)
        xn = (x - mu) * jax.lax.rsqrt(var + EPS)
        return xn * g[None, :, None, None] + b[None, :, None, None]

    out = jax.nn.relu(bn(conv(x, w1), g1, b1))
    out = bn(conv(out, w2), g2, b2) + x
    return jax.nn.relu(out)


if __name__ == "__main__":
    N, C, H, W = 2, 4, 16, 16          # inplanes = planes = 4
    inplanes = planes = C

    key = jax.random.PRNGKey(0)
    kx, k1, k2 = jax.random.split(key, 3)

    x = jax.random.normal(kx, (N, C, H, W), dtype=jnp.float32)

    # conv weights: kaiming-uniform-like bound 1/sqrt(fan_in); BN: gamma=1, beta=0
    fan_in = inplanes * 9
    bound = 1.0 / (fan_in ** 0.5)
    w1 = jax.random.uniform(k1, (planes, inplanes, 3, 3), jnp.float32, -bound, bound)
    w2 = jax.random.uniform(k2, (planes, planes, 3, 3), jnp.float32, -bound, bound)
    g1 = jnp.ones((planes,), jnp.float32)
    b1 = jnp.zeros((planes,), jnp.float32)
    g2 = jnp.ones((planes,), jnp.float32)
    b2 = jnp.zeros((planes,), jnp.float32)

    out = resblock_pallas(x, w1, g1, b1, w2, g2, b2)
    out = jax.block_until_ready(out)

    ref = resblock_reference(x, w1, g1, b1, w2, g2, b2)
    assert out.shape == ref.shape and out.dtype == ref.dtype
    assert jnp.allclose(out, ref, atol=2e-3, rtol=2e-3), "mismatch vs reference"

    print("KERNEL_OK")
</pallas_src>

<mosaic_0001>
module attributes {stable_mosaic.version = 11 : i64} {
  func.func @kernel(%arg0: memref<8x256xf32, #tpu.memory_space<vmem>>, %arg1: memref<8x72xf32, #tpu.memory_space<vmem>>, %arg2: memref<8x1xf32, #tpu.memory_space<vmem>>, %arg3: memref<8x1xf32, #tpu.memory_space<vmem>>, %arg4: memref<8x72xf32, #tpu.memory_space<vmem>>, %arg5: memref<8x1xf32, #tpu.memory_space<vmem>>, %arg6: memref<8x1xf32, #tpu.memory_space<vmem>>, %arg7: memref<8x8x256xf32, #tpu.memory_space<vmem>>, %arg8: memref<8x256xf32, #tpu.memory_space<vmem>>) attributes {dimension_semantics = [], scalar_prefetch = 0 : i64, scratch_operands = 0 : i64, tpu.core_type = #tpu.core_type<tc>} {
    %c0 = arith.constant 0 : index
    %c0_0 = arith.constant 0 : index
    %0 = vector.load %arg0[%c0, %c0_0] : memref<8x256xf32, #tpu.memory_space<vmem>>, vector<8x256xf32>
    %c0_1 = arith.constant 0 : index
    %c0_2 = arith.constant 0 : index
    %1 = vector.load %arg1[%c0_1, %c0_2] : memref<8x72xf32, #tpu.memory_space<vmem>>, vector<8x72xf32>
    %c17_i32 = arith.constant 17 : i32
    %2 = tpu.dynamic_rotate %0 by %c17_i32 dim 1 : vector<8x256xf32>, i32 -> vector<8x256xf32>
    %c0_3 = arith.constant 0 : index
    %c0_4 = arith.constant 0 : index
    %c0_5 = arith.constant 0 : index
    %3 = vector.load %arg7[%c0_3, %c0_4, %c0_5] : memref<8x8x256xf32, #tpu.memory_space<vmem>>, vector<1x8x256xf32>
    %4 = vector.shape_cast %3 : vector<1x8x256xf32> to vector<8x256xf32>
    %5 = arith.mulf %2, %4 : vector<8x256xf32>
    %c16_i32 = arith.constant 16 : i32
    %6 = tpu.dynamic_rotate %0 by %c16_i32 dim 1 : vector<8x256xf32>, i32 -> vector<8x256xf32>
    %c1 = arith.constant 1 : index
    %c0_6 = arith.constant 0 : index
    %c0_7 = arith.constant 0 : index
    %7 = vector.load %arg7[%c1, %c0_6, %c0_7] : memref<8x8x256xf32, #tpu.memory_space<vmem>>, vector<1x8x256xf32>
    %8 = vector.shape_cast %7 : vector<1x8x256xf32> to vector<8x256xf32>
    %9 = arith.mulf %6, %8 : vector<8x256xf32>
    %c15_i32 = arith.constant 15 : i32
    %10 = tpu.dynamic_rotate %0 by %c15_i32 dim 1 : vector<8x256xf32>, i32 -> vector<8x256xf32>
    %c2 = arith.constant 2 : index
    %c0_8 = arith.constant 0 : index
    %c0_9 = arith.constant 0 : index
    %11 = vector.load %arg7[%c2, %c0_8, %c0_9] : memref<8x8x256xf32, #tpu.memory_space<vmem>>, vector<1x8x256xf32>
    %12 = vector.shape_cast %11 : vector<1x8x256xf32> to vector<8x256xf32>
    %13 = arith.mulf %10, %12 : vector<8x256xf32>
    %c1_i32 = arith.constant 1 : i32
    %14 = tpu.dynamic_rotate %0 by %c1_i32 dim 1 : vector<8x256xf32>, i32 -> vector<8x256xf32>
    %c3 = arith.constant 3 : index
    %c0_10 = arith.constant 0 : index
    %c0_11 = arith.constant 0 : index
    %15 = vector.load %arg7[%c3, %c0_10, %c0_11] : memref<8x8x256xf32, #tpu.memory_space<vmem>>, vector<1x8x256xf32>
    %16 = vector.shape_cast %15 : vector<1x8x256xf32> to vector<8x256xf32>
    %17 = arith.mulf %14, %16 : vector<8x256xf32>
    %c255_i32 = arith.constant 255 : i32
    %18 = tpu.dynamic_rotate %0 by %c255_i32 dim 1 : vector<8x256xf32>, i32 -> vector<8x256xf32>
    %c4 = arith.constant 4 : index
    %c0_12 = arith.constant 0 : index
    %c0_13 = arith.constant 0 : index
    %19 = vector.load %arg7[%c4, %c0_12, %c0_13] : memref<8x8x256xf32, #tpu.memory_space<vmem>>, vector<1x8x256xf32>
    %20 = vector.shape_cast %19 : vector<1x8x256xf32> to vector<8x256xf32>
    %21 = arith.mulf %18, %20 : vector<8x256xf32>
    %c241_i32 = arith.constant 241 : i32
    %22 = tpu.dynamic_rotate %0 by %c241_i32 dim 1 : vector<8x256xf32>, i32 -> vector<8x256xf32>
    %c5 = arith.constant 5 : index
    %c0_14 = arith.constant 0 : index
    %c0_15 = arith.constant 0 : index
    %23 = vector.load %arg7[%c5, %c0_14, %c0_15] : memref<8x8x256xf32, #tpu.memory_space<vmem>>, vector<1x8x256xf32>
    %24 = vector.shape_cast %23 : vector<1x8x256xf32> to vector<8x256xf32>
    %25 = arith.mulf %22, %24 : vector<8x256xf32>
    %c240_i32 = arith.constant 240 : i32
    %26 = tpu.dynamic_rotate %0 by %c240_i32 dim 1 : vector<8x256xf32>, i32 -> vector<8x256xf32>
    %c6 = arith.constant 6 : index
    %c0_16 = arith.constant 0 : index
    %c0_17 = arith.constant 0 : index
    %27 = vector.load %arg7[%c6, %c0_16, %c0_17] : memref<8x8x256xf32, #tpu.memory_space<vmem>>, vector<1x8x256xf32>
    %28 = vector.shape_cast %27 : vector<1x8x256xf32> to vector<8x256xf32>
    %29 = arith.mulf %26, %28 : vector<8x256xf32>
    %c239_i32 = arith.constant 239 : i32
    %30 = tpu.dynamic_rotate %0 by %c239_i32 dim 1 : vector<8x256xf32>, i32 -> vector<8x256xf32>
    %c7 = arith.constant 7 : index
    %c0_18 = arith.constant 0 : index
    %c0_19 = arith.constant 0 : index
    %31 = vector.load %arg7[%c7, %c0_18, %c0_19] : memref<8x8x256xf32, #tpu.memory_space<vmem>>, vector<1x8x256xf32>
    %32 = vector.shape_cast %31 : vector<1x8x256xf32> to vector<8x256xf32>
    %33 = arith.mulf %30, %32 : vector<8x256xf32>
    %34 = tpu.concatenate %5, %9, %13, %17, %0, %21, %25, %29, %33 in 0 : vector<8x256xf32>, vector<8x256xf32>, vector<8x256xf32>, vector<8x256xf32>, vector<8x256xf32>, vector<8x256xf32>, vector<8x256xf32>, vector<8x256xf32>, vector<8x256xf32> -> vector<72x256xf32>
    %cst = arith.constant dense<0.000000e+00> : vector<8x256xf32>
    %35 = tpu.matmul %1, %34, %cst {dimension_numbers = #tpu.dot_dimension_numbers<[1], [0], [0], [1], [0, 0, 1, 1], [], []>} : vector<8x72xf32>, vector<72x256xf32>, vector<8x256xf32> -> vector<8x256xf32>
    %cst_20 = arith.constant dense<0.000000e+00> : vector<8xf32>
    %36 = vector.multi_reduction <add>, %35, %cst_20 [1] : vector<8x256xf32> to vector<8xf32>
    %37 = vector.shape_cast %36 : vector<8xf32> to vector<8x1xf32>
    %38 = arith.mulf %35, %35 : vector<8x256xf32>
    %cst_21 = arith.constant dense<0.000000e+00> : vector<8xf32>
    %39 = vector.multi_reduction <add>, %38, %cst_21 [1] : vector<8x256xf32> to vector<8xf32>
    %40 = vector.shape_cast %39 : vector<8xf32> to vector<8x1xf32>
    %c4_i32 = arith.constant 4 : i32
    %41 = tpu.dynamic_rotate %37 by %c4_i32 dim 0 : vector<8x1xf32>, i32 -> vector<8x1xf32>
    %42 = arith.addf %37, %41 : vector<8x1xf32>
    %c4_i32_22 = arith.constant 4 : i32
    %43 = tpu.dynamic_rotate %40 by %c4_i32_22 dim 0 : vector<8x1xf32>, i32 -> vector<8x1xf32>
    %44 = arith.addf %40, %43 : vector<8x1xf32>
    %cst_23 = arith.constant 0.001953125 : f32
    %45 = vector.broadcast %cst_23 : f32 to vector<8x1xf32>
    %46 = arith.mulf %42, %45 : vector<8x1xf32>
    %cst_24 = arith.constant 0.001953125 : f32
    %47 = vector.broadcast %cst_24 : f32 to vector<8x1xf32>
    %48 = arith.mulf %44, %47 : vector<8x1xf32>
    %49 = arith.mulf %46, %46 : vector<8x1xf32>
    %50 = arith.subf %48, %49 : vector<8x1xf32>
    %cst_25 = arith.constant 9.99999974E-6 : f32
    %51 = vector.broadcast %cst_25 : f32 to vector<8x1xf32>
    %52 = arith.addf %50, %51 : vector<8x1xf32>
    %53 = math.rsqrt %52 : vector<8x1xf32>
    %54 = vector.broadcast %46 : vector<8x1xf32> to vector<8x256xf32>
    %55 = arith.subf %35, %54 : vector<8x256xf32>
    %c0_26 = arith.constant 0 : index
    %c0_27 = arith.constant 0 : index
    %56 = vector.load %arg2[%c0_26, %c0_27] : memref<8x1xf32, #tpu.memory_space<vmem>>, vector<8x1xf32>
    %57 = arith.mulf %53, %56 : vector<8x1xf32>
    %58 = vector.broadcast %57 : vector<8x1xf32> to vector<8x256xf32>
    %59 = arith.mulf %55, %58 : vector<8x256xf32>
    %c0_28 = arith.constant 0 : index
    %c0_29 = arith.constant 0 : index
    %60 = vector.load %arg3[%c0_28, %c0_29] : memref<8x1xf32, #tpu.memory_space<vmem>>, vector<8x1xf32>
    %61 = vector.broadcast %60 : vector<8x1xf32> to vector<8x256xf32>
    %62 = arith.addf %59, %61 : vector<8x256xf32>
    %cst_30 = arith.constant 0.000000e+00 : f32
    %63 = vector.broadcast %cst_30 : f32 to vector<8x256xf32>
    %64 = arith.maximumf %62, %63 : vector<8x256xf32>
    %c0_31 = arith.constant 0 : index
    %c0_32 = arith.constant 0 : index
    %65 = vector.load %arg4[%c0_31, %c0_32] : memref<8x72xf32, #tpu.memory_space<vmem>>, vector<8x72xf32>
    %c17_i32_33 = arith.constant 17 : i32
    %66 = tpu.dynamic_rotate %64 by %c17_i32_33 dim 1 : vector<8x256xf32>, i32 -> vector<8x256xf32>
    %c0_34 = arith.constant 0 : index
    %c0_35 = arith.constant 0 : index
    %c0_36 = arith.constant 0 : index
    %67 = vector.load %arg7[%c0_34, %c0_35, %c0_36] : memref<8x8x256xf32, #tpu.memory_space<vmem>>, vector<1x8x256xf32>
    %68 = vector.shape_cast %67 : vector<1x8x256xf32> to vector<8x256xf32>
    %69 = arith.mulf %66, %68 : vector<8x256xf32>
    %c16_i32_37 = arith.constant 16 : i32
    %70 = tpu.dynamic_rotate %64 by %c16_i32_37 dim 1 : vector<8x256xf32>, i32 -> vector<8x256xf32>
    %c1_38 = arith.constant 1 : index
    %c0_39 = arith.constant 0 : index
    %c0_40 = arith.constant 0 : index
    %71 = vector.load %arg7[%c1_38, %c0_39, %c0_40] : memref<8x8x256xf32, #tpu.memory_space<vmem>>, vector<1x8x256xf32>
    %72 = vector.shape_cast %71 : vector<1x8x256xf32> to vector<8x256xf32>
    %73 = arith.mulf %70, %72 : vector<8x256xf32>
    %c15_i32_41 = arith.constant 15 : i32
    %74 = tpu.dynamic_rotate %64 by %c15_i32_41 dim 1 : vector<8x256xf32>, i32 -> vector<8x256xf32>
    %c2_42 = arith.constant 2 : index
    %c0_43 = arith.constant 0 : index
    %c0_44 = arith.constant 0 : index
    %75 = vector.load %arg7[%c2_42, %c0_43, %c0_44] : memref<8x8x256xf32, #tpu.memory_space<vmem>>, vector<1x8x256xf32>
    %76 = vector.shape_cast %75 : vector<1x8x256xf32> to vector<8x256xf32>
    %77 = arith.mulf %74, %76 : vector<8x256xf32>
    %c1_i32_45 = arith.constant 1 : i32
    %78 = tpu.dynamic_rotate %64 by %c1_i32_45 dim 1 : vector<8x256xf32>, i32 -> vector<8x256xf32>
    %c3_46 = arith.constant 3 : index
    %c0_47 = arith.constant 0 : index
    %c0_48 = arith.constant 0 : index
    %79 = vector.load %arg7[%c3_46, %c0_47, %c0_48] : memref<8x8x256xf32, #tpu.memory_space<vmem>>, vector<1x8x256xf32>
    %80 = vector.shape_cast %79 : vector<1x8x256xf32> to vector<8x256xf32>
    %81 = arith.mulf %78, %80 : vector<8x256xf32>
    %c255_i32_49 = arith.constant 255 : i32
    %82 = tpu.dynamic_rotate %64 by %c255_i32_49 dim 1 : vector<8x256xf32>, i32 -> vector<8x256xf32>
    %c4_50 = arith.constant 4 : index
    %c0_51 = arith.constant 0 : index
    %c0_52 = arith.constant 0 : index
    %83 = vector.load %arg7[%c4_50, %c0_51, %c0_52] : memref<8x8x256xf32, #tpu.memory_space<vmem>>, vector<1x8x256xf32>
    %84 = vector.shape_cast %83 : vector<1x8x256xf32> to vector<8x256xf32>
    %85 = arith.mulf %82, %84 : vector<8x256xf32>
    %c241_i32_53 = arith.constant 241 : i32
    %86 = tpu.dynamic_rotate %64 by %c241_i32_53 dim 1 : vector<8x256xf32>, i32 -> vector<8x256xf32>
    %c5_54 = arith.constant 5 : index
    %c0_55 = arith.constant 0 : index
    %c0_56 = arith.constant 0 : index
    %87 = vector.load %arg7[%c5_54, %c0_55, %c0_56] : memref<8x8x256xf32, #tpu.memory_space<vmem>>, vector<1x8x256xf32>
    %88 = vector.shape_cast %87 : vector<1x8x256xf32> to vector<8x256xf32>
    %89 = arith.mulf %86, %88 : vector<8x256xf32>
    %c240_i32_57 = arith.constant 240 : i32
    %90 = tpu.dynamic_rotate %64 by %c240_i32_57 dim 1 : vector<8x256xf32>, i32 -> vector<8x256xf32>
    %c6_58 = arith.constant 6 : index
    %c0_59 = arith.constant 0 : index
    %c0_60 = arith.constant 0 : index
    %91 = vector.load %arg7[%c6_58, %c0_59, %c0_60] : memref<8x8x256xf32, #tpu.memory_space<vmem>>, vector<1x8x256xf32>
    %92 = vector.shape_cast %91 : vector<1x8x256xf32> to vector<8x256xf32>
    %93 = arith.mulf %90, %92 : vector<8x256xf32>
    %c239_i32_61 = arith.constant 239 : i32
    %94 = tpu.dynamic_rotate %64 by %c239_i32_61 dim 1 : vector<8x256xf32>, i32 -> vector<8x256xf32>
    %c7_62 = arith.constant 7 : index
    %c0_63 = arith.constant 0 : index
    %c0_64 = arith.constant 0 : index
    %95 = vector.load %arg7[%c7_62, %c0_63, %c0_64] : memref<8x8x256xf32, #tpu.memory_space<vmem>>, vector<1x8x256xf32>
    %96 = vector.shape_cast %95 : vector<1x8x256xf32> to vector<8x256xf32>
    %97 = arith.mulf %94, %96 : vector<8x256xf32>
    %98 = tpu.concatenate %69, %73, %77, %81, %64, %85, %89, %93, %97 in 0 : vector<8x256xf32>, vector<8x256xf32>, vector<8x256xf32>, vector<8x256xf32>, vector<8x256xf32>, vector<8x256xf32>, vector<8x256xf32>, vector<8x256xf32>, vector<8x256xf32> -> vector<72x256xf32>
    %cst_65 = arith.constant dense<0.000000e+00> : vector<8x256xf32>
    %99 = tpu.matmul %65, %98, %cst_65 {dimension_numbers = #tpu.dot_dimension_numbers<[1], [0], [0], [1], [0, 0, 1, 1], [], []>} : vector<8x72xf32>, vector<72x256xf32>, vector<8x256xf32> -> vector<8x256xf32>
    %cst_66 = arith.constant dense<0.000000e+00> : vector<8xf32>
    %100 = vector.multi_reduction <add>, %99, %cst_66 [1] : vector<8x256xf32> to vector<8xf32>
    %101 = vector.shape_cast %100 : vector<8xf32> to vector<8x1xf32>
    %102 = arith.mulf %99, %99 : vector<8x256xf32>
    %cst_67 = arith.constant dense<0.000000e+00> : vector<8xf32>
    %103 = vector.multi_reduction <add>, %102, %cst_67 [1] : vector<8x256xf32> to vector<8xf32>
    %104 = vector.shape_cast %103 : vector<8xf32> to vector<8x1xf32>
    %c4_i32_68 = arith.constant 4 : i32
    %105 = tpu.dynamic_rotate %101 by %c4_i32_68 dim 0 : vector<8x1xf32>, i32 -> vector<8x1xf32>
    %106 = arith.addf %101, %105 : vector<8x1xf32>
    %c4_i32_69 = arith.constant 4 : i32
    %107 = tpu.dynamic_rotate %104 by %c4_i32_69 dim 0 : vector<8x1xf32>, i32 -> vector<8x1xf32>
    %108 = arith.addf %104, %107 : vector<8x1xf32>
    %cst_70 = arith.constant 0.001953125 : f32
    %109 = vector.broadcast %cst_70 : f32 to vector<8x1xf32>
    %110 = arith.mulf %106, %109 : vector<8x1xf32>
    %cst_71 = arith.constant 0.001953125 : f32
    %111 = vector.broadcast %cst_71 : f32 to vector<8x1xf32>
    %112 = arith.mulf %108, %111 : vector<8x1xf32>
    %113 = arith.mulf %110, %110 : vector<8x1xf32>
    %114 = arith.subf %112, %113 : vector<8x1xf32>
    %cst_72 = arith.constant 9.99999974E-6 : f32
    %115 = vector.broadcast %cst_72 : f32 to vector<8x1xf32>
    %116 = arith.addf %114, %115 : vector<8x1xf32>
    %117 = math.rsqrt %116 : vector<8x1xf32>
    %118 = vector.broadcast %110 : vector<8x1xf32> to vector<8x256xf32>
    %119 = arith.subf %99, %118 : vector<8x256xf32>
    %c0_73 = arith.constant 0 : index
    %c0_74 = arith.constant 0 : index
    %120 = vector.load %arg5[%c0_73, %c0_74] : memref<8x1xf32, #tpu.memory_space<vmem>>, vector<8x1xf32>
    %121 = arith.mulf %117, %120 : vector<8x1xf32>
    %122 = vector.broadcast %121 : vector<8x1xf32> to vector<8x256xf32>
    %123 = arith.mulf %119, %122 : vector<8x256xf32>
    %c0_75 = arith.constant 0 : index
    %c0_76 = arith.constant 0 : index
    %124 = vector.load %arg6[%c0_75, %c0_76] : memref<8x1xf32, #tpu.memory_space<vmem>>, vector<8x1xf32>
    %125 = vector.broadcast %124 : vector<8x1xf32> to vector<8x256xf32>
    %126 = arith.addf %123, %125 : vector<8x256xf32>
    %127 = arith.addf %126, %0 : vector<8x256xf32>
    %cst_77 = arith.constant 0.000000e+00 : f32
    %128 = vector.broadcast %cst_77 : f32 to vector<8x256xf32>
    %129 = arith.maximumf %127, %128 : vector<8x256xf32>
    %c0_78 = arith.constant 0 : index
    %c0_79 = arith.constant 0 : index
    %130 = vector.load %arg8[%c0_78, %c0_79] : memref<8x256xf32, #tpu.memory_space<vmem>>, vector<8x256xf32>
    tpu.vector_store %arg8[%c0_78, %c0_79], %129 {strides = array<i32>} : memref<8x256xf32, #tpu.memory_space<vmem>>, vector<8x256xf32>,
    return
  }
}

</mosaic_0001>

<bundles_post_ra>
// kernel: tile.23
= control target key start
LH: loop header
LB: loop body
LE: loop exit
PB: predicated region body
PF: predicated region fallthrough
CT: control target
= control target key end

     0   :  { %s22_s0 = inlined_call_operand.vmem [shape: f32[4], index: 0, kind: input, shape index: {}]   ;;  %s23_s1 = inlined_call_operand.vmem [shape: f32[2,4], index: 1, kind: output, shape index: {}]  }
   0x1   :  { %v4_v0 = vld [vmem:[%s22_s0] ss:$0 sm:$0xff] }
   0x2   :  { %5 = vst [vmem:[%s23_s1] sm:$0x3] %v4_v0 }

// kernel: tile.0
= control target key start
LH: loop header
LB: loop body
LE: loop exit
PB: predicated region body
PF: predicated region fallthrough
CT: control target
= control target key end

     0   :  { %s35_s8 = smov 125   ;;  %vm8_vm0 = vcmask 7168   ;;  %s36_s11 = smov 126   ;;  %s62_s0 = inlined_call_operand.vmem [shape: f32[2,4], index: 0, kind: input, shape index: {}]   ;;  %s63_s1 = inlined_call_operand.vmem [shape: f32[8,1], index: 1, kind: output, shape index: {}]  }
   0x1   :  { %v5_v0 = vld [vmem:[%s62_s0] sm:$0x3]  ;;  %s34_s0 = smov 127  }
   0x2   :  { %6 = vst [vmem:[#allocation0] sm:$0x3] %v5_v0 }
   0x9   :  { %v10_v1 = vld [vmem:[#allocation0] sm:$0x3]  }
   0xa   :  { %v22_v2 = vld [vmem:[#allocation0] sm:$0x3]   ;;  %11 = vrot.lane.b32.xlu0 %v10_v1, %s34_s0 }
   0xb   :  { %23 = vrot.lane.b32.xlu1 %v22_v2, %s35_s8  ;;  %v7_v3 = vld [vmem:[#allocation0] sm:$0x3]  }
   0xc   :  { %v16_v4 = vld [vmem:[#allocation0] sm:$0x3]   ;;  %9 = vst.msk [vmem:[%s63_s1] ss:$4 sm:$0x3] %vm8_vm0, %v7_v3  }
   0xe   :  { %17 = vrot.lane.b32.xlu0 %v16_v4, %s36_s11 }
  0x7c   :  { %v12_v5 = vpop.permute.xlu0 %11  }
  0x7d   :  { %v24_v6 = vpop.permute.xlu1 %23   ;;  %28 = vst.msk [vmem:[%s63_s1 + $0x1] ss:$4 sm:$0x3] %vm8_vm0, %v12_v5  }
  0x7e   :  { %30 = vst.msk [vmem:[%s63_s1 + $0x3] ss:$4 sm:$0x3] %vm8_vm0, %v24_v6  }
  0x80   :  { %v18_v7 = vpop.permute.xlu0 %17  }
  0x81   :  { %29 = vst.msk [vmem:[%s63_s1 + $0x2] ss:$4 sm:$0x3] %vm8_vm0, %v18_v7  }

// kernel: resblock_pallas.1
= control target key start
LH: loop header
LB: loop body
LE: loop exit
PB: predicated region body
PF: predicated region fallthrough
CT: control target
= control target key end

     0   :  { %s471_s29 = smov 112   ;;  %s472_s30 = smov 111   ;;  %v476_v2 = vmov 0.0   ;;  %v36_v3 = vlaneseq  ;;  %vm129_vm8 = vcmask 588800   ;;  %s800_s0 = inlined_call_operand.vmem [shape: f32[8,256], index: 0, kind: input, shape index: {}]   ;;  %s801_s7 = inlined_call_operand.vmem [shape: f32[8,8,256], index: 7, kind: input, shape index: {}]   ;;  %s802_s1 = inlined_call_operand.vmem [shape: f32[8,72], index: 1, kind: input, shape index: {}]   ;;  %s803_s2 = inlined_call_operand.vmem [shape: f32[8,1], index: 2, kind: input, shape index: {}]   ;;  %s804_s3 = inlined_call_operand.vmem [shape: f32[8,1], index: 3, kind: input, shape index: {}]   ;;  %s805_s4 = inlined_call_operand.vmem [shape: f32[8,72], index: 4, kind: input, shape index: {}]   ;;  %s806_s5 = inlined_call_operand.vmem [shape: f32[8,1], index: 5, kind: input, shape index: {}]   ;;  %s807_s6 = inlined_call_operand.vmem [shape: f32[8,1], index: 6, kind: input, shape index: {}]   ;;  %s808_s8 = inlined_call_operand.vmem [shape: f32[8,256], index: 8, kind: output, shape index: {}]  }
   0x1   :  { %v529_v0 = vld [vmem:[%s800_s0] sm:$0xff]  ;;  %v538_v1 = vld [vmem:[%s800_s0 + $0x8] sm:$0xff]  ;;  %s473_s11 = smov 113   ;;  %s474_s12 = smov 127   ;;  %197 = vmatprep.mubr.f32.mxu0 %v476_v2  ;;  %380 = vmatprep.mubr.f32.mxu1 %v476_v2  ;;  %v575_v7 = vld [vmem:[%s801_s7 + $0x78] sm:$0xff] }
   0x2   :  { %105 = vrot.lane.b32.xlu1 %v529_v0, %s471_s29  ;;  %117 = vrot.lane.b32.xlu0 %v529_v0, %s472_s30  ;;  %s475_s0 = smov 1   ;;  %s477_s13 = smov 15   ;;  %v568_v4 = vand.u32 127, %v36_v3  ;;  %v580_v8 = vld [vmem:[%s801_s7 + $0x70] sm:$0xff]  ;;  %v585_v11 = vld [vmem:[%s801_s7 + $0x68] sm:$0xff] }
   0x3   :  { %s478_s14 = smov 16   ;;  %s479_s15 = smov 17   ;;  %v596_v15 = vld [vmem:[%s801_s7 + $0x60] sm:$0xff]  ;;  %v606_v19 = vld [vmem:[%s801_s7 + $0x50] sm:$0xff]  ;;  %v611_v20 = vld [vmem:[%s801_s7 + $0x58] sm:$0xff] }
   0x4   :  { %vm109_vm0 = vcmp.lt.s32.totalorder %v568_v4, 112  ;;  %vm121_vm1 = vcmp.lt.s32.totalorder %v568_v4, 111  ;;  %vm97_vm2 = vcmp.lt.s32.totalorder %v568_v4, 113  ;;  %vm85_vm3 = vcmp.lt.s32.totalorder %v568_v4, 127  ;;  %v625_v29 = vld [vmem:[%s801_s7 + $0x40] sm:$0xff]  ;;  %v630_v30 = vld [vmem:[%s801_s7 + $0x48] sm:$0xff] }
   0x5   :  { %vm73_vm4 = vcmp.lt.s32.totalorder %v568_v4, 1  ;;  %v642_v37 = vld [vmem:[%s801_s7 + $0x30] sm:$0xff]  ;;  %v647_v38 = vld [vmem:[%s801_s7 + $0x38] sm:$0xff]  ;;  %vm61_vm5 = vcmp.lt.s32.totalorder %v568_v4, 15  ;;  %v661_v45 = vld [vmem:[%s801_s7 + $0x20] sm:$0xff]  ;;  %vm49_vm6 = vcmp.lt.s32.totalorder %v568_v4, 16 }
   0x6   :  { %107 = vrot.lane.b32.xlu1 %v538_v1, %s471_s29  ;;  %119 = vrot.lane.b32.xlu0 %v538_v1, %s472_s30  ;;  %v666_v46 = vld [vmem:[%s801_s7 + $0x28] sm:$0xff]  ;;  %v678_v53 = vld [vmem:[%s801_s7 + $0x10] sm:$0xff]  ;;  %vm38_vm7 = vcmp.lt.s32.totalorder %v568_v4, 17 }
   0x7   :  { %v683_v54 = vld [vmem:[%s801_s7 + $0x18] sm:$0xff]  ;;  %v695_v61 = vld [vmem:[%s801_s7] sm:$0xff]  ;;  %v700_v62 = vld [vmem:[%s801_s7 + $0x8] sm:$0xff] }
   0xa   :  { %95 = vrot.lane.b32.xlu1 %v538_v1, %s473_s11  ;;  %93 = vrot.lane.b32.xlu0 %v529_v0, %s473_s11 }
   0xe   :  { %83 = vrot.lane.b32.xlu1 %v538_v1, %s474_s12  ;;  %81 = vrot.lane.b32.xlu0 %v529_v0, %s474_s12 }
  0x12   :  { %71 = vrot.lane.b32.xlu1 %v538_v1, %s475_s0  ;;  %69 = vrot.lane.b32.xlu0 %v529_v0, %s475_s0 }
  0x16   :  { %59 = vrot.lane.b32.xlu1 %v538_v1, %s477_s13  ;;  %57 = vrot.lane.b32.xlu0 %v529_v0, %s477_s13 }
  0x1a   :  { %47 = vrot.lane.b32.xlu1 %v538_v1, %s478_s14  ;;  %45 = vrot.lane.b32.xlu0 %v529_v0, %s478_s14 }
  0x1e   :  { %34 = vrot.lane.b32.xlu1 %v538_v1, %s479_s15  ;;  %32 = vrot.lane.b32.xlu0 %v529_v0, %s479_s15 }
  0x74   :  { %v106_v5 = vpop.permute.xlu1 %105  ;;  %v118_v6 = vpop.permute.xlu0 %117 }
  0x78   :  { %v108_v9 = vpop.permute.xlu1 %107  ;;  %v120_v10 = vpop.permute.xlu0 %119 }
  0x79   :  { %v111_v12 = vsel %vm109_vm0, %v108_v9, %v106_v5  ;;  %v122_v13 = vsel %vm121_vm1, %v118_v6, %v120_v10  ;;  %v123_v14 = vsel %vm121_vm1, %v120_v10, %v118_v6  ;;  %v110_v16 = vsel %vm109_vm0, %v106_v5, %v108_v9  ;;  %v31_v10 = vld [vmem:[%s802_s1] sm:$0xff] }
  0x7a   :  { %v128_v17 = vmul.f32 %v575_v7, %v123_v14  ;;  %v127_v18 = vmul.f32 %v580_v8, %v122_v13  ;;  %v116_v21 = vmul.f32 %v585_v11, %v111_v12  ;;  %v115_v24 = vmul.f32 %v596_v15, %v110_v16 }
  0x7c   :  { %v96_v22 = vpop.permute.xlu1 %95  ;;  %147 = vmatprep.subr.mxu0 %v128_v17  ;;  %v94_v23 = vpop.permute.xlu0 %93 }
  0x7d   :  { %v98_v25 = vsel %vm97_vm2, %v94_v23, %v96_v22  ;;  %v99_v26 = vsel %vm97_vm2, %v96_v22, %v94_v23  ;;  %148 = vmatpush1.msra.mxu0 %v127_v18 }
  0x7e   :  { %v103_v27 = vmul.f32 %v606_v19, %v98_v25  ;;  %v104_v28 = vmul.f32 %v611_v20, %v99_v26  ;;  %149 = vmatprep.subr.mxu0 %v116_v21  ;;  %v480_v21 = vmov 0  }
  0x7f   :  { %150 = vmatpush1.msra.mxu0 %v115_v24  ;;  %465 = vset.pattern.permute.xlu0 %v480_v21 }
  0x80   :  { %v84_v31 = vpop.permute.xlu1 %83  ;;  %151 = vmatprep.subr.mxu0 %v104_v28  ;;  %v82_v32 = vpop.permute.xlu0 %81  ;;  %466 = vset.pattern.permute.xlu1 %v480_v21 }
  0x81   :  { %v86_v33 = vsel %vm85_vm3, %v82_v32, %v84_v31  ;;  %v87_v34 = vsel %vm85_vm3, %v84_v31, %v82_v32  ;;  %152 = vmatpush1.msra.mxu0 %v103_v27 }
  0x82   :  { %v91_v35 = vmul.f32 %v625_v29, %v86_v33  ;;  %v92_v36 = vmul.f32 %v630_v30, %v87_v34 }
  0x84   :  { %v72_v39 = vpop.permute.xlu1 %71  ;;  %153 = vmatprep.subr.mxu0 %v92_v36  ;;  %v70_v40 = vpop.permute.xlu0 %69 }
  0x85   :  { %v74_v41 = vsel %vm73_vm4, %v70_v40, %v72_v39  ;;  %v75_v42 = vsel %vm73_vm4, %v72_v39, %v70_v40  ;;  %154 = vmatpush1.msra.mxu0 %v91_v35  ;;  %v229_v35 = vld [vmem:[%s803_s2] sm:$0xff] }
  0x86   :  { %v79_v43 = vmul.f32 %v642_v37, %v75_v42  ;;  %v80_v44 = vmul.f32 %v647_v38, %v74_v41  ;;  %155 = vmatprep.subr.mxu0 %v538_v1  ;;  %v238_v40 = vld [vmem:[%s804_s3] sm:$0xff] }
  0x87   :  { %156 = vmatpush1.msra.mxu0 %v529_v0 }
  0x88   :  { %v60_v47 = vpop.permute.xlu1 %59  ;;  %157 = vmatprep.subr.mxu0 %v80_v44  ;;  %v58_v48 = vpop.permute.xlu0 %57 }
  0x89   :  { %v62_v49 = vsel %vm61_vm5, %v58_v48, %v60_v47  ;;  %v63_v50 = vsel %vm61_vm5, %v60_v47, %v58_v48  ;;  %158 = vmatpush1.msra.mxu0 %v79_v43 }
  0x8a   :  { %v67_v51 = vmul.f32 %v661_v45, %v63_v50  ;;  %v68_v52 = vmul.f32 %v666_v46, %v62_v49 }
  0x8c   :  { %v48_v55 = vpop.permute.xlu1 %47  ;;  %159 = vmatprep.subr.mxu0 %v68_v52  ;;  %v46_v56 = vpop.permute.xlu0 %45 }
  0x8d   :  { %v50_v57 = vsel %vm49_vm6, %v46_v56, %v48_v55  ;;  %v51_v58 = vsel %vm49_vm6, %v48_v55, %v46_v56  ;;  %160 = vmatpush1.msra.mxu0 %v67_v51 }
  0x8e   :  { %v55_v59 = vmul.f32 %v678_v53, %v51_v58  ;;  %v56_v60 = vmul.f32 %v683_v54, %v50_v57 }
  0x90   :  { %v35_v63 = vpop.permute.xlu1 %34  ;;  %161 = vmatprep.subr.mxu0 %v56_v60  ;;  %v33_v2 = vpop.permute.xlu0 %32 }
  0x91   :  { %v39_v3 = vsel %vm38_vm7, %v33_v2, %v35_v63  ;;  %v40_v5 = vsel %vm38_vm7, %v35_v63, %v33_v2  ;;  %162 = vmatpush1.msra.mxu0 %v55_v59 }
  0x92   :  { %v43_v6 = vmul.f32 %v695_v61, %v40_v5  ;;  %v44_v9 = vmul.f32 %v700_v62, %v39_v3 }
  0x94   :  { %163 = vmatprep.subr.mxu0 %v44_v9 }
  0x95   :  { %164 = vmatpush1.msra.mxu0 %v43_v6 }
  0x96   :  { %453 = vmatmul.mubr.msk.f32.vlgmr.msra.gmra.mxu0 %vm129_vm8, %v31_v10 }
 0x156   :  { %v199_v12 = vpop.f32.mrf.mxu0 }
 0x157   :  { %v207_v17 = vmul.f32 %v199_v12, %v199_v12 }
 0x158   :  { %v201_v13 = vpop.f32.mrf.mxu0 }
 0x159   :  { %v208_v14 = vmul.f32 %v201_v13, %v201_v13  ;;  %v204_v16 = vadd.f32 %v201_v13, %v199_v12 }
 0x15b   :  { %205 = vadd.xlane.f32.xlu0 %v204_v16  ;;  %v209_v18 = vadd.f32 %v208_v14, %v207_v17 }
 0x15d   :  { %210 = vadd.xlane.f32.xlu1 %v209_v18 }
 0x1e4   :  { %v206_v22 = vpop.xlane.xlu0 %205 }
 0x1e5   :  { %v212_v23 = vrot.slane %v206_v22, 4 }
 0x1e6   :  { %v211_v24 = vpop.xlane.xlu1 %210 }
 0x1e7   :  { %v213_v25 = vadd.f32 %v212_v23, %v206_v22  ;;  %v214_v26 = vrot.slane %v211_v24, 4 }
 0x1e9   :  { %v216_v27 = vmul.f32 0.001953125, %v213_v25  ;;  %v215_v28 = vadd.f32 %v214_v26, %v211_v24 }
 0x1eb   :  { %v218_v31 = vmul.f32 %v216_v27, %v216_v27  ;;  %v217_v32 = vmul.f32 0.001953125, %v215_v28  ;;  %224 = vperm.xlu0 %465, %v216_v27  }
 0x1ed   :  { %v219_v33 = vsub.f32 %v217_v32, %v218_v31 }
 0x1ef   :  { %v220_v34 = vadd.f32 1e-05, %v219_v33 }
 0x1f1   :  { %467 = vrsqrt.f32 %v220_v34 }
 0x1fe   :  { %v468_v36 = vpop.eup %467 }
 0x1ff   :  { %v230_v39 = vmul.f32 %v468_v36, %v229_v35 }
 0x201   :  { %233 = vperm.xlu1 %466, %v230_v39  }
 0x205   :  { %241 = vperm.xlu1 %466, %v238_v40  }
 0x266   :  { %v225_v41 = vpop.permute.xlu0 %224 }
 0x267   :  { %v227_v43 = vsub.f32 %v199_v12, %v225_v41  ;;  %v228_v44 = vsub.f32 %v201_v13, %v225_v41 }
 0x27c   :  { %v234_v42 = vpop.permute.xlu1 %233 }
 0x27d   :  { %v236_v47 = vmul.f32 %v234_v42, %v227_v43  ;;  %v237_v48 = vmul.f32 %v234_v42, %v228_v44 }
 0x280   :  { %v242_v49 = vpop.permute.xlu1 %241 }
 0x281   :  { %v244_v50 = vadd.f32 %v242_v49, %v236_v47  ;;  %v245_v51 = vadd.f32 %v242_v49, %v237_v48 }
 0x283   :  { %v246_v52 = vmax.f32 %v244_v50, 0.0  ;;  %v247_v55 = vmax.f32 %v245_v51, 0.0 }
 0x285   :  { %291 = vrot.lane.b32.xlu0 %v247_v55, %s473_s11  ;;  %305 = vrot.lane.b32.xlu1 %v246_v52, %s472_s30 }
 0x289   :  { %283 = vrot.lane.b32.xlu0 %v247_v55, %s474_s12  ;;  %307 = vrot.lane.b32.xlu1 %v247_v55, %s472_s30 }
 0x28d   :  { %275 = vrot.lane.b32.xlu0 %v247_v55, %s475_s0  ;;  %297 = vrot.lane.b32.xlu1 %v246_v52, %s471_s29 }
 0x291   :  { %267 = vrot.lane.b32.xlu0 %v247_v55, %s477_s13  ;;  %299 = vrot.lane.b32.xlu1 %v247_v55, %s471_s29 }
 0x295   :  { %259 = vrot.lane.b32.xlu0 %v247_v55, %s478_s14  ;;  %289 = vrot.lane.b32.xlu1 %v246_v52, %s473_s11 }
 0x299   :  { %251 = vrot.lane.b32.xlu0 %v247_v55, %s479_s15  ;;  %281 = vrot.lane.b32.xlu1 %v246_v52, %s474_s12 }
 0x29d   :  { %273 = vrot.lane.b32.xlu1 %v246_v52, %s475_s0 }
 0x2a1   :  { %265 = vrot.lane.b32.xlu1 %v246_v52, %s477_s13 }
 0x2a5   :  { %257 = vrot.lane.b32.xlu1 %v246_v52, %s478_s14 }
 0x2a9   :  { %249 = vrot.lane.b32.xlu1 %v246_v52, %s479_s15 }
 0x2f7   :  { %v306_v56 = vpop.permute.xlu1 %305  ;;  %v292_v60 = vpop.permute.xlu0 %291 }
 0x2fb   :  { %v308_v57 = vpop.permute.xlu1 %307  ;;  %v284_v5 = vpop.permute.xlu0 %283 }
 0x2fc   :  { %v309_v58 = vsel %vm121_vm1, %v306_v56, %v308_v57  ;;  %v310_v59 = vsel %vm121_vm1, %v308_v57, %v306_v56 }
 0x2fd   :  { %v312_v63 = vmul.f32 %v575_v7, %v310_v59  ;;  %v311_v2 = vmul.f32 %v580_v8, %v309_v58 }
 0x2ff   :  { %330 = vmatprep.subr.mxu1 %v312_v63  ;;  %v298_v3 = vpop.permute.xlu1 %297  ;;  %v276_v16 = vpop.permute.xlu0 %275 }
 0x300   :  { %331 = vmatpush1.msra.mxu1 %v311_v2 }
 0x303   :  { %v300_v6 = vpop.permute.xlu1 %299  ;;  %v268_v24 = vpop.permute.xlu0 %267 }
 0x304   :  { %v301_v9 = vsel %vm109_vm0, %v298_v3, %v300_v6  ;;  %v302_v10 = vsel %vm109_vm0, %v300_v6, %v298_v3  ;;  %v421_v3 = vld [vmem:[%s807_s6] sm:$0xff] }
 0x305   :  { %v303_v12 = vmul.f32 %v596_v15, %v301_v9  ;;  %v304_v13 = vmul.f32 %v585_v11, %v302_v10 }
 0x307   :  { %332 = vmatprep.subr.mxu1 %v304_v13  ;;  %v290_v14 = vpop.permute.xlu1 %289  ;;  %v260_v31 = vpop.permute.xlu0 %259 }
 0x308   :  { %v293_v7 = vsel %vm97_vm2, %v290_v14, %v292_v60  ;;  %v294_v8 = vsel %vm97_vm2, %v292_v60, %v290_v14  ;;  %333 = vmatpush1.msra.mxu1 %v303_v12  ;;  %v412_v60 = vld [vmem:[%s806_s5] sm:$0xff] }
 0x309   :  { %v295_v17 = vmul.f32 %v606_v19, %v293_v7  ;;  %v296_v18 = vmul.f32 %v611_v20, %v294_v8 }
 0x30b   :  { %334 = vmatprep.subr.mxu1 %v296_v18  ;;  %v282_v21 = vpop.permute.xlu1 %281  ;;  %v252_v39 = vpop.permute.xlu0 %251 }
 0x30c   :  { %v285_v15 = vsel %vm85_vm3, %v282_v21, %v284_v5  ;;  %v286_v11 = vsel %vm85_vm3, %v284_v5, %v282_v21  ;;  %335 = vmatpush1.msra.mxu1 %v295_v17 }
 0x30d   :  { %v287_v22 = vmul.f32 %v625_v29, %v285_v15  ;;  %v288_v23 = vmul.f32 %v630_v30, %v286_v11 }
 0x30f   :  { %336 = vmatprep.subr.mxu1 %v288_v23  ;;  %v274_v25 = vpop.permute.xlu1 %273 }
 0x310   :  { %v277_v19 = vsel %vm73_vm4, %v274_v25, %v276_v16  ;;  %v278_v20 = vsel %vm73_vm4, %v276_v16, %v274_v25  ;;  %337 = vmatpush1.msra.mxu1 %v287_v22 }
 0x311   :  { %v279_v26 = vmul.f32 %v642_v37, %v278_v20  ;;  %v280_v27 = vmul.f32 %v647_v38, %v277_v19  ;;  %338 = vmatprep.subr.mxu1 %v247_v55 }
 0x312   :  { %339 = vmatpush1.msra.mxu1 %v246_v52 }
 0x313   :  { %340 = vmatprep.subr.mxu1 %v280_v27  ;;  %v266_v29 = vpop.permute.xlu1 %265 }
 0x314   :  { %v269_v30 = vsel %vm61_vm5, %v266_v29, %v268_v24  ;;  %v270_v28 = vsel %vm61_vm5, %v268_v24, %v266_v29  ;;  %341 = vmatpush1.msra.mxu1 %v279_v26 }
 0x315   :  { %v271_v32 = vmul.f32 %v661_v45, %v270_v28  ;;  %v272_v33 = vmul.f32 %v666_v46, %v269_v30 }
 0x317   :  { %342 = vmatprep.subr.mxu1 %v272_v33  ;;  %v258_v37 = vpop.permute.xlu1 %257 }
 0x318   :  { %v261_v38 = vsel %vm49_vm6, %v258_v37, %v260_v31  ;;  %v262_v34 = vsel %vm49_vm6, %v260_v31, %v258_v37  ;;  %343 = vmatpush1.msra.mxu1 %v271_v32 }
 0x319   :  { %v263_v35 = vmul.f32 %v678_v53, %v262_v34  ;;  %v264_v36 = vmul.f32 %v683_v54, %v261_v38  ;;  %v248_v53 = vld [vmem:[%s805_s4] sm:$0xff] }
 0x31b   :  { %344 = vmatprep.subr.mxu1 %v264_v36  ;;  %v250_v40 = vpop.permute.xlu1 %249 }
 0x31c   :  { %v253_v45 = vsel %vm38_vm7, %v250_v40, %v252_v39  ;;  %v254_v46 = vsel %vm38_vm7, %v252_v39, %v250_v40  ;;  %345 = vmatpush1.msra.mxu1 %v263_v35 }
 0x31d   :  { %v255_v41 = vmul.f32 %v254_v46, %v695_v61  ;;  %v256_v42 = vmul.f32 %v253_v45, %v700_v62 }
 0x31f   :  { %346 = vmatprep.subr.mxu1 %v256_v42 }
 0x320   :  { %347 = vmatpush1.msra.mxu1 %v255_v41 }
 0x321   :  { %454 = vmatmul.mubr.msk.f32.vlgmr.msra.gmra.mxu1 %vm129_vm8, %v248_v53 }
 0x3e1   :  { %v382_v54 = vpop.f32.mrf.mxu1 }
 0x3e2   :  { %v390_v48 = vmul.f32 %v382_v54, %v382_v54 }
 0x3e3   :  { %v384_v43 = vpop.f32.mrf.mxu1 }
 0x3e4   :  { %v391_v44 = vmul.f32 %v384_v43, %v384_v43  ;;  %v387_v47 = vadd.f32 %v384_v43, %v382_v54 }
 0x3e6   :  { %388 = vadd.xlane.f32.xlu1 %v387_v47  ;;  %v392_v4 = vadd.f32 %v391_v44, %v390_v48 }
 0x3e8   :  { %393 = vadd.xlane.f32.xlu0 %v392_v4 }
 0x46f   :  { %v389_v49 = vpop.xlane.xlu1 %388 }
 0x470   :  { %v395_v61 = vrot.slane %v389_v49, 4 }
 0x471   :  { %v394_v50 = vpop.xlane.xlu0 %393 }
 0x472   :  { %v396_v62 = vadd.f32 %v395_v61, %v389_v49  ;;  %v397_v51 = vrot.slane %v394_v50, 4 }
 0x474   :  { %v399_v52 = vmul.f32 0.001953125, %v396_v62  ;;  %v398_v55 = vadd.f32 %v397_v51, %v394_v50 }
 0x476   :  { %v401_v56 = vmul.f32 %v399_v52, %v399_v52  ;;  %v400_v57 = vmul.f32 0.001953125, %v398_v55  ;;  %407 = vperm.xlu0 %465, %v399_v52  }
 0x478   :  { %v402_v58 = vsub.f32 %v400_v57, %v401_v56 }
 0x47a   :  { %v403_v59 = vadd.f32 1e-05, %v402_v58 }
 0x47c   :  { %469 = vrsqrt.f32 %v403_v59 }
 0x489   :  { %v470_v63 = vpop.eup %469 }
 0x48a   :  { %v413_v2 = vmul.f32 %v470_v63, %v412_v60 }
 0x48c   :  { %416 = vperm.xlu1 %466, %v413_v2  }
 0x490   :  { %424 = vperm.xlu1 %466, %v421_v3  }
 0x4f1   :  { %v408_v5 = vpop.permute.xlu0 %407 }
 0x4f2   :  { %v410_v9 = vsub.f32 %v382_v54, %v408_v5  ;;  %v411_v10 = vsub.f32 %v384_v43, %v408_v5 }
 0x507   :  { %v417_v6 = vpop.permute.xlu1 %416 }
 0x508   :  { %v419_v12 = vmul.f32 %v417_v6, %v410_v9  ;;  %v420_v13 = vmul.f32 %v417_v6, %v411_v10 }
 0x50b   :  { %v425_v14 = vpop.permute.xlu1 %424 }
 0x50c   :  { %v427_v7 = vadd.f32 %v425_v14, %v419_v12  ;;  %v428_v8 = vadd.f32 %v425_v14, %v420_v13 }
 0x50e   :  { %v429_v16 = vadd.f32 %v427_v7, %v529_v0  ;;  %v430_v17 = vadd.f32 %v428_v8, %v538_v1 }
 0x510   :  { %v431_v18 = vmax.f32 %v429_v16, 0.0  ;;  %v432_v21 = vmax.f32 %v430_v17, 0.0 }
 0x512   :  { %433 = vst [vmem:[%s808_s8] sm:$0xff] %v431_v18  ;;  %434 = vst [vmem:[%s808_s8 + $0x8] sm:$0xff] %v432_v21 }

</bundles_post_ra>
